<compile_context>
chip_gen: v7x
topology: tpu7x:2x2x1
jax: 0.10.0
libtpu: 0.0.40
codegen_flags: <defaults>
</compile_context>

<pallas_src>
import functools

import jax
import jax.numpy as jnp
from jax.experimental import pallas as pl
from jax.experimental.pallas import tpu as pltpu


# Lane-rows (of 128 pixels) streamed per grid step. Multiple of 32 so a row tile is
# sublane-aligned for f32(8) / bf16(16) / int8,bool(32) packing. 2048 rows => ~3 MiB
# f32 per step: per-step DMA >> the ~0.35us fixed step overhead, and the whole
# double-buffered working set (~16 MiB worst case incl. temporaries) fits v7x VMEM.
_MAX_STEP_ROWS = 2048


def _wce_kernel(pred_ref, target_ref, out_ref, acc_ref, *,
                w2_edge, w2_bg, rows, tile_r, acc_rows, need_row_mask):
    j = pl.program_id(1)

    @pl.when(j == 0)
    def _():
        acc_ref[...] = jnp.zeros_like(acc_ref)

    # Class planes, cast on the VPU in-kernel (DMA streams the native dtype).
    x0 = pred_ref[:, 0].astype(jnp.float32)      # [nb, tile_r, 128] background logits
    x1 = pred_ref[:, 1].astype(jnp.float32)      # [nb, tile_r, 128] edge logits

    # Native-dtype compare (no full-tile int cast).
    # TODO(synk): exact `== 1` assumes hard {0,1} labels (matches target.long() masks).
    is_edge = target_ref[...] == 1

    # Closed-form binary CE: nll = softplus(-s), s = logit margin of the target class.
    d = x1 - x0
    s = jnp.where(is_edge, d, -d)
    nll = jnp.maximum(-s, 0.0) + jnp.log1p(jnp.exp(-jnp.abs(s)))   # stable softplus(-s)
    w2 = jnp.where(is_edge, jnp.float32(w2_edge), jnp.float32(w2_bg))
    contrib = nll * w2                            # [nb, tile_r, 128]

    if need_row_mask:
        # Only possible when nb == 1 (rows > _MAX_STEP_ROWS): zero the out-of-bounds
        # tail rows of the last (garbage-padded) block.
        ri = jax.lax.broadcasted_iota(jnp.int32, (tile_r, 128), 0)
        contrib = jnp.where((j * tile_r + ri)[None] < rows, contrib, 0.0)

    if acc_rows == 8:
        # Fold the tile with pure vreg adds into an (8,128) accumulator: avoids a
        # tile-sized accumulator ld+st per step and any per-step cross-lane work.
        acc_ref[...] += contrib.reshape(-1, 8, 128).sum(axis=0)
    else:
        # Tiny-step fallback (total rows per step not a multiple of 8).
        acc_ref[...] += contrib.sum(axis=(0, 1))[None, :]

    @pl.when(j == pl.num_programs(1) - 1)
    def _():
        # Single small cross-sublane reduce per batch block -> lane partial (1,1,128).
        out_ref[...] = jnp.sum(acc_ref[...], axis=0, keepdims=True)[None]


def _largest_divisor_le(n, cap):
    cap = max(1, min(n, cap))
    for d in range(cap, 0, -1):
        if n % d == 0:
            return d
    return 1


def weighted_cross_entropy_loss(pred, target, weight_edge=10.0, weight_bg=1.0):
    """pred: [N, C=2, H, W] logits (any float dtype); target: [N, H, W] binary mask
    (float / int / bool — streamed in its native dtype)."""
    N, C, H, W = pred.shape
    assert C == 2, "binary edge/background loss expects 2 classes"
    HW = H * W
    # TODO(synk): pad/mask the last partial lane-row if H*W is not a multiple of 128.
    assert HW % 128 == 0, "H*W must be a multiple of 128"
    rows = HW // 128

    if rows > _MAX_STEP_ROWS:
        tile_r = _MAX_STEP_ROWS                   # aligned (mult. of 32) row tile
        nb = 1
    else:
        tile_r = rows                             # full spatial extent per image
        nb = _largest_divisor_le(N, _MAX_STEP_ROWS // rows)   # images per step

    num_batch_blocks = N // nb
    num_row_tiles = pl.cdiv(rows, tile_r)
    need_row_mask = (rows % tile_r) != 0
    acc_rows = 8 if (nb * tile_r) % 8 == 0 else 1

    # Free reshapes (no transpose, no dtype cast in the wrapper).
    pred4 = pred.reshape(N, C, rows, 128)
    tgt3 = target.reshape(N, rows, 128)

    kernel = functools.partial(
        _wce_kernel,
        w2_edge=float(weight_edge) ** 2,
        w2_bg=float(weight_bg) ** 2,
        rows=rows,
        tile_r=tile_r,
        acc_rows=acc_rows,
        need_row_mask=need_row_mask,
    )

    partials = pl.pallas_call(
        kernel,
        out_shape=jax.ShapeDtypeStruct((num_batch_blocks, 1, 128), jnp.float32),
        grid_spec=pltpu.PrefetchScalarGridSpec(
            num_scalar_prefetch=0,
            grid=(num_batch_blocks, num_row_tiles),
            in_specs=[
                pl.BlockSpec((nb, C, tile_r, 128), lambda b, j: (b, 0, j, 0)),
                pl.BlockSpec((nb, tile_r, 128), lambda b, j: (b, j, 0)),
            ],
            out_specs=pl.BlockSpec((1, 1, 128), lambda b, j: (b, 0, 0)),
            scratch_shapes=[pltpu.VMEM((acc_rows, 128), jnp.float32)],
        ),
        compiler_params=pltpu.CompilerParams(
            dimension_semantics=("parallel", "arbitrary"),
            vmem_limit_bytes=32 * 1024 * 1024,
        ),
    )(pred4, tgt3)

    # `.mean()` over all pixels with reduction='none' => divide by N*H*W.
    return jnp.sum(partials) / jnp.float32(N * HW)


def _reference_loss(pred, target, weight_edge=10.0, weight_bg=1.0):
    tgt = target.astype(jnp.int32)
    logp = jax.nn.log_softmax(pred.astype(jnp.float32), axis=1)
    nll = -jnp.take_along_axis(logp, tgt[:, None], axis=1)[:, 0]   # [N, H, W]
    w = jnp.where(tgt == 1, weight_edge, weight_bg).astype(jnp.float32)
    return jnp.mean(nll * w * w)


if __name__ == "__main__":
    key = jax.random.PRNGKey(0)
    k1, k2, k3, k4 = jax.random.split(key, 4)

    # Test 1: tiny image, f32 logits / f32 mask (batched-images path, acc_rows=1).
    N, C, H, W = 2, 2, 16, 16
    pred = jax.random.normal(k1, (N, C, H, W), dtype=jnp.float32)
    target = jax.random.bernoulli(k2, p=0.3, shape=(N, H, W)).astype(jnp.float32)
    loss = jax.block_until_ready(weighted_cross_entropy_loss(pred, target, 10, 1))
    ref = jax.block_until_ready(_reference_loss(pred, target, 10.0, 1.0))
    assert jnp.allclose(loss, ref, rtol=1e-5, atol=1e-5), (loss, ref)

    # Test 2: bf16 logits + int8 mask (narrow-dtype streaming, aligned acc_rows=8 path).
    N2, H2, W2 = 2, 64, 64
    pred2 = jax.random.normal(k3, (N2, C, H2, W2), dtype=jnp.float32).astype(jnp.bfloat16)
    target2 = jax.random.bernoulli(k4, p=0.3, shape=(N2, H2, W2)).astype(jnp.int8)
    loss2 = jax.block_until_ready(weighted_cross_entropy_loss(pred2, target2, 10, 1))
    ref2 = jax.block_until_ready(_reference_loss(pred2, target2, 10.0, 1.0))
    assert jnp.allclose(loss2, ref2, rtol=1e-4, atol=1e-4), (loss2, ref2)

    print("KERNEL_OK")
</pallas_src>

<mosaic_0001>
module attributes {stable_mosaic.version = 11 : i64} {
  func.func @_wce_kernel(%arg0: i32, %arg1: i32, %arg2: memref<2x2x2x128xf32, #tpu.memory_space<vmem>>, %arg3: memref<2x2x128xf32, #tpu.memory_space<vmem>>, %arg4: memref<1x1x128xf32, #tpu.memory_space<vmem>>, %arg5: memref<1x128xf32, #tpu.memory_space<vmem>>) attributes {dimension_semantics = [#tpu.dimension_semantics<parallel>, #tpu.dimension_semantics<arbitrary>], iteration_bounds = array<i64: 1, 1>, scalar_prefetch = 0 : i64, scratch_operands = 1 : i64, tpu.core_type = #tpu.core_type<tc>, window_params = [{transform_indices = @transform_0, window_bounds = array<i64: 2, 2, 2, 128>}, {transform_indices = @transform_1, window_bounds = array<i64: 2, 2, 128>}, {transform_indices = @transform_2, window_bounds = array<i64: 1, 1, 128>}]} {
    %c0_i32 = arith.constant 0 : i32
    %0 = arith.cmpi eq, %arg1, %c0_i32 : i32
    %1 = arith.extui %0 : i1 to i32
    %c0_i32_0 = arith.constant 0 : i32
    %2 = arith.cmpi ne, %1, %c0_i32_0 : i32
    scf.if %2 {
      %cst_23 = arith.constant 0.000000e+00 : f32
      %36 = vector.broadcast %cst_23 : f32 to vector<1x128xf32>
      %c0_24 = arith.constant 0 : index
      %c0_25 = arith.constant 0 : index
      %37 = vector.load %arg5[%c0_24, %c0_25] : memref<1x128xf32, #tpu.memory_space<vmem>>, vector<1x128xf32>
      tpu.vector_store %arg5[%c0_24, %c0_25], %36 {strides = array<i32>} : memref<1x128xf32, #tpu.memory_space<vmem>>, vector<1x128xf32>,
    } else {
    }
    %c0 = arith.constant 0 : index
    %c0_1 = arith.constant 0 : index
    %c0_2 = arith.constant 0 : index
    %c0_3 = arith.constant 0 : index
    %3 = vector.load %arg2[%c0, %c0_1, %c0_2, %c0_3] : memref<2x2x2x128xf32, #tpu.memory_space<vmem>>, vector<2x1x2x128xf32>
    %4 = vector.shape_cast %3 : vector<2x1x2x128xf32> to vector<2x2x128xf32>
    %c0_4 = arith.constant 0 : index
    %c1 = arith.constant 1 : index
    %c0_5 = arith.constant 0 : index
    %c0_6 = arith.constant 0 : index
    %5 = vector.load %arg2[%c0_4, %c1, %c0_5, %c0_6] : memref<2x2x2x128xf32, #tpu.memory_space<vmem>>, vector<2x1x2x128xf32>
    %6 = vector.shape_cast %5 : vector<2x1x2x128xf32> to vector<2x2x128xf32>
    %c0_7 = arith.constant 0 : index
    %c0_8 = arith.constant 0 : index
    %c0_9 = arith.constant 0 : index
    %7 = vector.load %arg3[%c0_7, %c0_8, %c0_9] : memref<2x2x128xf32, #tpu.memory_space<vmem>>, vector<2x2x128xf32>
    %cst = arith.constant 1.000000e+00 : f32
    %8 = vector.broadcast %cst : f32 to vector<2x2x128xf32>
    %9 = arith.cmpf oeq, %7, %8 : vector<2x2x128xf32>
    %10 = arith.subf %6, %4 : vector<2x2x128xf32>
    %cst_10 = arith.constant 0.000000e+00 : f32
    %11 = vector.broadcast %cst_10 : f32 to vector<2x2x128xf32>
    %12 = arith.subf %11, %10 : vector<2x2x128xf32>
    %13 = arith.select %9, %10, %12 : vector<2x2x128xi1>, vector<2x2x128xf32>
    %cst_11 = arith.constant 0.000000e+00 : f32
    %14 = vector.broadcast %cst_11 : f32 to vector<2x2x128xf32>
    %15 = arith.subf %14, %13 : vector<2x2x128xf32>
    %cst_12 = arith.constant 0.000000e+00 : f32
    %16 = vector.broadcast %cst_12 : f32 to vector<2x2x128xf32>
    %17 = arith.maximumf %15, %16 : vector<2x2x128xf32>
    %18 = math.absf %13 : vector<2x2x128xf32>
    %cst_13 = arith.constant 0.000000e+00 : f32
    %19 = vector.broadcast %cst_13 : f32 to vector<2x2x128xf32>
    %20 = arith.subf %19, %18 : vector<2x2x128xf32>
    %21 = math.exp %20 : vector<2x2x128xf32>
    %22 = math.log1p %21 : vector<2x2x128xf32>
    %23 = arith.addf %17, %22 : vector<2x2x128xf32>
    %cst_14 = arith.constant 1.000000e+02 : f32
    %cst_15 = arith.constant 1.000000e+00 : f32
    %24 = vector.broadcast %cst_14 : f32 to vector<2x2x128xf32>
    %25 = vector.broadcast %cst_15 : f32 to vector<2x2x128xf32>
    %26 = arith.select %9, %24, %25 : vector<2x2x128xi1>, vector<2x2x128xf32>
    %27 = arith.mulf %23, %26 : vector<2x2x128xf32>
    %c0_16 = arith.constant 0 : index
    %c0_17 = arith.constant 0 : index
    %28 = vector.load %arg5[%c0_16, %c0_17] : memref<1x128xf32, #tpu.memory_space<vmem>>, vector<1x128xf32>
    %cst_18 = arith.constant dense<0.000000e+00> : vector<128xf32>
    %29 = vector.multi_reduction <add>, %27, %cst_18 [0, 1] : vector<2x2x128xf32> to vector<128xf32>
    %30 = vector.shape_cast %29 : vector<128xf32> to vector<1x128xf32>
    %31 = arith.addf %28, %30 : vector<1x128xf32>
    %c0_19 = arith.constant 0 : index
    %c0_20 = arith.constant 0 : index
    %32 = vector.load %arg5[%c0_19, %c0_20] : memref<1x128xf32, #tpu.memory_space<vmem>>, vector<1x128xf32>
    tpu.vector_store %arg5[%c0_19, %c0_20], %31 {strides = array<i32>} : memref<1x128xf32, #tpu.memory_space<vmem>>, vector<1x128xf32>,
    %c0_i32_21 = arith.constant 0 : i32
    %33 = arith.cmpi eq, %arg1, %c0_i32_21 : i32
    %34 = arith.extui %33 : i1 to i32
    %c0_i32_22 = arith.constant 0 : i32
    %35 = arith.cmpi ne, %34, %c0_i32_22 : i32
    scf.if %35 {
      %c0_23 = arith.constant 0 : index
      %c0_24 = arith.constant 0 : index
      %36 = vector.load %arg5[%c0_23, %c0_24] : memref<1x128xf32, #tpu.memory_space<vmem>>, vector<1x128xf32>
      %cst_25 = arith.constant dense<0.000000e+00> : vector<128xf32>
      %37 = vector.multi_reduction <add>, %36, %cst_25 [0] : vector<1x128xf32> to vector<128xf32>
      %38 = vector.shape_cast %37 : vector<128xf32> to vector<1x128xf32>
      %39 = vector.shape_cast %38 : vector<1x128xf32> to vector<1x1x128xf32>
      %c0_26 = arith.constant 0 : index
      %c0_27 = arith.constant 0 : index
      %c0_28 = arith.constant 0 : index
      %40 = vector.load %arg4[%c0_26, %c0_27, %c0_28] : memref<1x1x128xf32, #tpu.memory_space<vmem>>, vector<1x1x128xf32>
      tpu.vector_store %arg4[%c0_26, %c0_27, %c0_28], %39 {strides = array<i32>} : memref<1x1x128xf32, #tpu.memory_space<vmem>>, vector<1x1x128xf32>,
    } else {
    }
    return
  }
  func.func @transform_0(%arg0: i32, %arg1: i32) -> (i32, i32, i32, i32) {
    %c0_i32 = arith.constant 0 : i32
    %c0_i32_0 = arith.constant 0 : i32
    %c0_i32_1 = arith.constant 0 : i32
    return %arg0, %c0_i32, %arg1, %c0_i32_0 : i32, i32, i32, i32
  }
  func.func @transform_1(%arg0: i32, %arg1: i32) -> (i32, i32, i32) {
    %c0_i32 = arith.constant 0 : i32
    %c0_i32_0 = arith.constant 0 : i32
    return %arg0, %arg1, %c0_i32 : i32, i32, i32
  }
  func.func @transform_2(%arg0: i32, %arg1: i32) -> (i32, i32, i32) {
    %c0_i32 = arith.constant 0 : i32
    %c0_i32_0 = arith.constant 0 : i32
    %c0_i32_1 = arith.constant 0 : i32
    return %arg0, %c0_i32, %c0_i32_0 : i32, i32, i32
  }
}

</mosaic_0001>

<bundles_post_ra>
// kernel: tpu_custom_call.1
= control target key start
LH: loop header
LB: loop body
LE: loop exit
PB: predicated region body
PF: predicated region fallthrough
CT: control target
= control target key end

     0   :  { %7 = vsyncpa [#allocation4], 0  ;;  %s280_s0 = inlined_call_operand.hbm [shape: f32[2,2,2,128], index: 0, kind: input, shape index: {}]   ;;  %s281_s1 = inlined_call_operand.hbm [shape: f32[2,2,128], index: 1, kind: input, shape index: {}]   ;;  %s282_s2 = inlined_call_operand.hbm [shape: f32[1,1,128], index: 2, kind: output, shape index: {}]  }
   0x1   :  { %8 = vsyncpa [#allocation7], 0 }
   0x2   :  { %9 = vsyncpa [#allocation5], 0  ;;  %s218_s9 = smov [#allocation3]   ;;  %s146_s13 = scalar_lea.hbm %s280_s0, 128 }
   0x3   :  { %s15_s10 = sshll.u32 %s218_s9, 4  ;;  %p147_p0 = scmp.ne.s32.totalorder %s280_s0, %s146_s13  ;;  %s16_s10 = int_to_ptr.vmem [resolvable:$true] %s15_s10 }
   0x4   :  { %p150_p1 = scmp.lt.u32.totalorder %s146_s13, %s280_s0 }
   0x6   :  { %p152_p2 = pnand %p150_p1, %p147_p0 }
   0x8   :  { %155 = shalt.err (!%p152_p2)
}
   0x9   :  { %s156_s18 = scalar_lea.vmem %s16_s10, 128  ;;  %p161_p4 = scmp.lt.s32.totalorder %s16_s10, %s16_s10 }
   0xa   :  { %p157_p3 = scmp.ne.s32.totalorder %s16_s10, %s156_s18  ;;  %p162_p5 = scmp.lt.s32.totalorder %s156_s18, %s156_s18 }
   0xc   :  { %p163_p6 = por %p162_p5, %p161_p4 }
   0xe   :  { %p164_p7 = pnand %p163_p6, %p157_p3 }
  0x10   :  { %167 = shalt.err (!%p164_p7)
}
  0x11   :  { %s219_s19 = smov 32   ;;  %s220_s20 = smov 2  }
  0x12   :  { %21 = dma.hbm_to_vmem [thread:$0]  %s280_s0, 128, %s16_s10, [#allocation4], %s219_s19, %s219_s19, %s220_s20  }
  0x13   :  { %s221_s23 = smov [#allocation6]   ;;  %s168_s27 = scalar_lea.hbm %s281_s1, 64 }
  0x14   :  { %s27_s24 = sshll.u32 %s221_s23, 4  ;;  %p169_p8 = scmp.ne.s32.totalorder %s281_s1, %s168_s27  ;;  %s28_s24 = int_to_ptr.vmem [resolvable:$true] %s27_s24 }
  0x15   :  { %p172_p9 = scmp.lt.u32.totalorder %s168_s27, %s281_s1 }
  0x17   :  { %p174_p10 = pnand %p172_p9, %p169_p8 }
  0x19   :  { %177 = shalt.err (!%p174_p10)
}
  0x1a   :  { %s178_s4 = scalar_lea.vmem %s28_s24, 64  ;;  %p183_p12 = scmp.lt.s32.totalorder %s28_s24, %s28_s24 }
  0x1b   :  { %p179_p11 = scmp.ne.s32.totalorder %s28_s24, %s178_s4  ;;  %p184_p13 = scmp.lt.s32.totalorder %s178_s4, %s178_s4 }
  0x1d   :  { %p185_p0 = por %p184_p13, %p183_p12 }
  0x1f   :  { %p186_p1 = pnand %p185_p0, %p179_p11 }
  0x21   :  { %189 = shalt.err (!%p186_p1)
}
  0x22   :  { %33 = dma.hbm_to_vmem [thread:$0]  %s281_s1, 64, %s28_s24, [#allocation7], %s219_s19, %s219_s19, %s220_s20  }
  0x23   :  { %212 = dma.done.wait [#allocation4], 128  }
  0x24   :  { %213 = vsyncadd [#allocation4], 4294967168 }
  0x25   :  { %214 = dma.done.wait [#allocation7], 64  }
  0x26   :  { %215 = vsyncadd [#allocation7], 4294967232  ;;  %v222_v0 = vmov 0.0   ;;  %v45_v1 = vld [vmem:[#allocation3] sm:$0x3]  ;;  %v223_v40 = vmov 1.0  }
  0x27   :  { %44 = vst [vmem:[#allocation2] sm:$0x1] %v222_v0  ;;  %v46_v2 = vld [vmem:[#allocation3 + $0x4] sm:$0x3]  ;;  %v48_v3 = vld [vmem:[#allocation3 + $0x2] sm:$0x3] }
  0x28   :  { %v49_v4 = vld [vmem:[#allocation3 + $0x6] sm:$0x3]  ;;  %v50_v5 = vld [vmem:[#allocation6] sm:$0x3]  ;;  %v51_v6 = vld [vmem:[#allocation6 + $0x2] sm:$0x3]  ;;  %v54_v7 = vsub.f32 %v48_v3, %v45_v1 }
  0x29   :  { %vm52_vm0 = vcmp.eq.f32.partialorder %v50_v5, 1.0  ;;  %v55_v8 = vsub.f32 %v49_v4, %v46_v2  ;;  %vm53_vm1 = vcmp.eq.f32.partialorder %v51_v6, 1.0  ;;  %vm97_vm4 = vcmask 1041408   ;;  %s224_s1 = smov [#allocation8]  }
  0x2a   :  { %v56_v9 = vsub.f32 0.0, %v54_v7  ;;  %v92_v41 = vsel %vm52_vm0, 100.0, %v223_v40  ;;  %v93_v44 = vsel %vm53_vm1, 100.0, %v223_v40  ;;  %s121_s6 = sshll.u32 %s224_s1, 4  ;;  %s122_s6 = int_to_ptr.vmem [resolvable:$true] %s121_s6 }
  0x2b   :  { %v57_v10 = vsub.f32 0.0, %v55_v8  ;;  %s190_s7 = scalar_lea.vmem %s122_s6, 16  ;;  %s194_s8 = scalar_lea.vmem %s122_s6, 32 }
  0x2c   :  { %v58_v11 = vsel %vm52_vm0, %v54_v7, %v56_v9  ;;  %p191_p2 = scmp.ne.s32.totalorder %s122_s6, %s190_s7  ;;  %p195_p3 = scmp.lt.s32.totalorder %s122_s6, %s122_s6 }
  0x2d   :  { %v59_v12 = vsel %vm53_vm1, %v55_v8, %v57_v10  ;;  %v64_v13 = vand.u32 2147483647, %v58_v11  ;;  %v60_v26 = vsub.f32 0.0, %v58_v11  ;;  %p196_p4 = scmp.lt.s32.totalorder %s194_s8, %s190_s7 }
  0x2e   :  { %v65_v14 = vand.u32 2147483647, %v59_v12  ;;  %v61_v29 = vsub.f32 0.0, %v59_v12  ;;  %v96_v56 = vld [vmem:[#allocation2] sm:$0x1] }
  0x2f   :  { %v66_v15 = vsub.f32 0.0, %v64_v13  ;;  %v62_v33 = vmax.f32 %v60_v26, 0.0  ;;  %p197_p5 = por %p196_p4, %p195_p3 }
  0x30   :  { %v67_v16 = vsub.f32 0.0, %v65_v14  ;;  %v63_v36 = vmax.f32 %v61_v29, 0.0 }
  0x31   :  { %v68_v17 = vmul.f32 1.442695, %v66_v15  ;;  %p198_p6 = pnand %p197_p5, %p191_p2 }
  0x32   :  { %v70_v18 = vmul.f32 1.442695, %v67_v16 }
  0x33   :  { %138 = vpow2.f32 %v68_v17 }
  0x34   :  { %140 = vpow2.f32 %v70_v18 }
  0x3d   :  { %v139_v19 = vpop.eup %138 }
  0x3e   :  { %v141_v20 = vpop.eup %140  ;;  %v72_v21 = vadd.f32 1.0, %v139_v19  ;;  %v75_v23 = vmul.f32 -0.5, %v139_v19  ;;  %v78_v27 = vand.u32 2147483647, %v139_v19 }
  0x3f   :  { %v81_v22 = vadd.f32 1.0, %v141_v20  ;;  %v84_v24 = vmul.f32 -0.5, %v141_v20  ;;  %v87_v30 = vand.u32 2147483647, %v141_v20 }
  0x40   :  { %142 = vlog2.f32 %v72_v21  ;;  %v76_v25 = vadd.f32 1.0, %v75_v23  ;;  %vm79_vm2 = vcmp.lt.f32.partialorder %v78_v27, 0.0004427343 }
  0x41   :  { %144 = vlog2.f32 %v81_v22  ;;  %v85_v28 = vadd.f32 1.0, %v84_v24  ;;  %vm88_vm3 = vcmp.lt.f32.partialorder %v87_v30, 0.0004427343 }
  0x42   :  { %v77_v31 = vmul.f32 %v139_v19, %v76_v25 }
  0x43   :  { %v86_v34 = vmul.f32 %v141_v20, %v85_v28 }
  0x4a   :  { %v143_v32 = vpop.eup %142 }
  0x4b   :  { %v145_v35 = vpop.eup %144  ;;  %v74_v37 = vmul.f32 0.6931472, %v143_v32 }
  0x4c   :  { %v83_v38 = vmul.f32 0.6931472, %v145_v35 }
  0x4d   :  { %v80_v39 = vsel %vm79_vm2, %v77_v31, %v74_v37 }
  0x4e   :  { %v89_v42 = vsel %vm88_vm3, %v86_v34, %v83_v38  ;;  %v90_v43 = vadd.f32 %v80_v39, %v62_v33 }
  0x4f   :  { %v91_v45 = vadd.f32 %v89_v42, %v63_v36 }
  0x50   :  { %v94_v46 = vmul.f32 %v92_v41, %v90_v43 }
  0x51   :  { %v95_v47 = vmul.f32 %v93_v44, %v91_v45 }
  0x52   :  { %v98_v48 = vsel %vm97_vm4, %v94_v46, 0.0 }
  0x53   :  { %v99_v49 = vsel %vm97_vm4, %v95_v47, 0.0 }
  0x54   :  { %v100_v50 = vadd.f32 %v99_v49, %v98_v48 }
  0x56   :  { %v101_v51 = vrot.slane %v100_v50, 4 }
  0x58   :  { %v102_v52 = vadd.f32 %v101_v51, %v100_v50 }
  0x5a   :  { %v103_v53 = vrot.slane %v102_v52, 2 }
  0x5c   :  { %v104_v54 = vadd.f32 %v103_v53, %v102_v52 }
  0x5e   :  { %v105_v55 = vrot.slane %v104_v54, 1 }
  0x60   :  { %v106_v57 = vadd.f32 %v105_v55, %v104_v54 }
  0x62   :  { %v107_v58 = vadd.f32 %v106_v57, %v96_v56 }
  0x64   :  { %108 = vst [vmem:[#allocation2] sm:$0x1] %v107_v58 }
  0x6b   :  { %v112_v59 = vld [vmem:[#allocation2] sm:$0x1] }
  0x6c   :  { %114 = vst [vmem:[#allocation8] sm:$0x1] %v112_v59 }
  0x6d   :  { %201 = shalt.err (!%p198_p6)
}
  0x6e   :  { %s202_s11 = scalar_lea.hbm %s282_s2, 16 }
  0x6f   :  { %p203_p7 = scmp.ne.s32.totalorder %s282_s2, %s202_s11  ;;  %p206_p8 = scmp.lt.u32.totalorder %s202_s11, %s282_s2 }
  0x71   :  { %p208_p9 = pnand %p206_p8, %p203_p7 }
  0x73   :  { %211 = shalt.err (!%p208_p9)
}
  0x74   :  { %124 = dma.vmem_to_hbm [thread:$0]  %s122_s6, 16, %s282_s2, [#allocation5]  }
  0x75   :  { %216 = dma.done.wait [#allocation5], 16  }
  0x76   :  { %217 = vsyncadd [#allocation5], 4294967280 }
  0x77   :  { %128 = vsyncpa [#allocation4], 1 }
  0x78   :  { %129 = vsyncpa [#allocation7], 1 }
  0x79   :  { %130 = vsyncpa [#allocation5], 1 }

</bundles_post_ra>
